<compile_context>
chip_gen: v7x
topology: tpu7x:2x2x1
jax: 0.10.0
libtpu: 0.0.40
codegen_flags: <defaults>
</compile_context>

<pallas_src>
import functools

import jax
import jax.numpy as jnp
from jax.experimental import pallas as pl
from jax.experimental.pallas import tpu as pltpu


def _round_up(v, m):
    return (v + m - 1) // m * m


def _resblock_kernel(x_ref, w_ref, shift_ref, o_ref, *, use_res, res_row):
    # x_ref    : (1, KC_p, TL)   bf16   im2col'ed input tile
    # w_ref    : (C_out_p, KC_p) bf16   conv weight with BN scale folded in (resident)
    # shift_ref: (C_out_p, 1)    f32    folded BN shift = beta - mean * scale (resident)
    # o_ref    : (1, C_out_p, TL)
    x = x_ref[0]                                                        # (KC_p, TL) bf16
    acc = jnp.dot(w_ref[...], x, preferred_element_type=jnp.float32)   # (C_out_p, TL) f32
    out = acc + shift_ref[...]
    if use_res:
        c_out_p = o_ref.shape[1]
        # Residual taken from the already-loaded block: rows [pad*C_in, pad*C_in + C_out)
        # of the im2col input are exactly x for this tile (extra padded rows are cropped
        # by the wrapper, so reading past C_out within the block is harmless).
        out = out + x[res_row:res_row + c_out_p, :].astype(jnp.float32)
    o_ref[0] = jnp.tanh(out).astype(o_ref.dtype)


def residual_block_forward(x, weight, gamma, beta, running_mean, running_var,
                           *, kernel_size, stride=1, use_res=True, eps=1e-5,
                           l_tile=512):
    """x: (N, C_in, L) float32.  weight: (C_out, C_in, K) float32 (conv bias=False)."""
    assert l_tile % 128 == 0
    N, C_in, L = x.shape
    C_out, C_in_w, K = weight.shape
    assert C_in_w == C_in and K == kernel_size
    pad = kernel_size // 2
    L_out = (L + 2 * pad - K) // stride + 1
    if use_res:
        assert stride == 1 and C_in == C_out and L_out == L, \
            "residual requires matching shapes (as in the PyTorch module)"

    # ---- glue (plain JAX): fold BN scale, im2col taps, aligned padding ----
    scale = gamma / jnp.sqrt(running_var + eps)                           # (C_out,)
    shift = (beta - running_mean * scale).astype(jnp.float32)

    KC = K * C_in
    res_row = pad * C_in
    C_out_p = _round_up(C_out, 8)            # unmasked f32 sublane stores
    KC_p = _round_up(KC, 16)                 # bf16 sublane packing of contraction dim
    if use_res:
        KC_p = max(KC_p, _round_up(res_row + C_out_p, 16))   # keep residual slice in-bounds

    # weight -> (C_out_p, KC_p); column index = j*C_in + c matches im2col row order.
    w2 = jnp.transpose(weight, (0, 2, 1)).reshape(C_out, KC) * scale[:, None]
    w2 = jnp.pad(w2, ((0, C_out_p - C_out), (0, KC_p - KC))).astype(jnp.bfloat16)
    shift_p = jnp.pad(shift, (0, C_out_p - C_out)).reshape(C_out_p, 1)

    # Lane-aligned L tiling: TL multiple of 128, padded length Lp = n_tiles * TL.
    TL = l_tile if L_out >= l_tile else _round_up(L_out, 128)
    n_tiles = pl.cdiv(L_out, TL)
    Lp = n_tiles * TL
    need_len = K + stride * (Lp - 1)                   # length required by im2col slices
    rpad = max(need_len - pad - L, pad)
    x_p = jnp.pad(x, ((0, 0), (0, 0), (pad, rpad)))    # (N, C_in, pad + L + rpad)
    # im2col (stride-aware): X2[n, j*C_in + c, t] = x_padded[n, c, j + t*stride]
    taps = [x_p[:, :, j:j + stride * (Lp - 1) + 1:stride] for j in range(K)]
    x2 = jnp.stack(taps, axis=1).reshape(N, KC, Lp)
    x2 = jnp.pad(x2, ((0, 0), (0, KC_p - KC), (0, 0))).astype(jnp.bfloat16)

    kernel = functools.partial(_resblock_kernel, use_res=use_res, res_row=res_row)

    # VMEM budget: double-buffered x/out tiles + resident weight/shift (+ margin).
    need = 2 * (KC_p * TL * 2 + C_out_p * TL * 4) + C_out_p * KC_p * 2 + C_out_p * 4
    vmem_limit = int(min(max(4 * need + (1 << 20), 16 << 20), 56 << 20))

    out = pl.pallas_call(
        kernel,
        out_shape=jax.ShapeDtypeStruct((N, C_out_p, Lp), x.dtype),
        grid_spec=pltpu.PrefetchScalarGridSpec(
            num_scalar_prefetch=0,
            grid=(N, n_tiles),
            in_specs=[
                pl.BlockSpec((1, KC_p, TL), lambda n, t: (n, 0, t)),    # im2col'ed x tile
                pl.BlockSpec((C_out_p, KC_p), lambda n, t: (0, 0)),     # scaled weight (resident)
                pl.BlockSpec((C_out_p, 1), lambda n, t: (0, 0)),        # BN shift (resident)
            ],
            out_specs=pl.BlockSpec((1, C_out_p, TL), lambda n, t: (n, 0, t)),
        ),
        compiler_params=pltpu.CompilerParams(
            dimension_semantics=("parallel", "parallel"),
            vmem_limit_bytes=vmem_limit),
    )(x2, w2, shift_p)
    return out[:, :C_out, :L_out]


def _reference(x, weight, gamma, beta, running_mean, running_var,
               *, kernel_size, stride=1, use_res=True, eps=1e-5):
    """Pure-JAX reference emulating the kernel's bf16 input rounding (f32 accumulation)."""
    pad = kernel_size // 2
    scale = gamma / jnp.sqrt(running_var + eps)
    shift = beta - running_mean * scale
    w = (weight * scale[:, None, None]).astype(jnp.bfloat16).astype(jnp.float32)
    xq = x.astype(jnp.bfloat16).astype(jnp.float32)
    conv = jax.lax.conv_general_dilated(
        xq, w, window_strides=(stride,), padding=[(pad, pad)],
        dimension_numbers=("NCH", "OIH", "NCH"))
    out = conv + shift[None, :, None]
    if use_res:
        out = out + xq            # kernel reads the residual from the bf16 im2col block
    return jnp.tanh(out)


def _run_case(key, N, C_in, C_out, L, kernel_size, stride, use_res):
    k_x, k_w, k_g, k_b, k_m, k_v = jax.random.split(key, 6)
    x = jax.random.normal(k_x, (N, C_in, L), dtype=jnp.float32)
    fan_in = C_in * kernel_size
    fan_out = C_out * kernel_size
    weight = jax.random.uniform(k_w, (C_out, C_in, kernel_size), jnp.float32,
                                -1.0, 1.0) * (6.0 / (fan_in + fan_out)) ** 0.5
    gamma = 1.0 + 0.1 * jax.random.normal(k_g, (C_out,), jnp.float32)
    beta = 0.1 * jax.random.normal(k_b, (C_out,), jnp.float32)
    running_mean = 0.1 * jax.random.normal(k_m, (C_out,), jnp.float32)
    running_var = 1.0 + 0.1 * jax.random.uniform(k_v, (C_out,), jnp.float32)

    out = residual_block_forward(
        x, weight, gamma, beta, running_mean, running_var,
        kernel_size=kernel_size, stride=stride, use_res=use_res)
    out = jax.block_until_ready(out)

    ref = _reference(x, weight, gamma, beta, running_mean, running_var,
                     kernel_size=kernel_size, stride=stride, use_res=use_res)
    assert out.shape == ref.shape, (out.shape, ref.shape)
    assert jnp.allclose(out, ref, atol=1e-4, rtol=1e-4), "mismatch vs reference"


if __name__ == "__main__":
    key = jax.random.PRNGKey(0)
    k_a, k_b = jax.random.split(key)

    # Case A: residual path (stride=1, C_in == C_out), dropout p=0.5 in eval -> identity.
    _run_case(k_a, N=2, C_in=4, C_out=4, L=16, kernel_size=3, stride=1, use_res=True)

    # Case B: non-residual, strided, channel-expanding variant of the same module.
    _run_case(k_b, N=2, C_in=4, C_out=8, L=16, kernel_size=5, stride=2, use_res=False)

    print("KERNEL_OK")
</pallas_src>

<mosaic_0001>
module attributes {stable_mosaic.version = 11 : i64} {
  func.func @_resblock_kernel(%arg0: i32, %arg1: i32, %arg2: memref<1x16x128xbf16, #tpu.memory_space<vmem>>, %arg3: memref<8x16xbf16, #tpu.memory_space<vmem>>, %arg4: memref<8x1xf32, #tpu.memory_space<vmem>>, %arg5: memref<1x8x128xf32, #tpu.memory_space<vmem>>) attributes {dimension_semantics = [#tpu.dimension_semantics<parallel>, #tpu.dimension_semantics<parallel>], iteration_bounds = array<i64: 2, 1>, scalar_prefetch = 0 : i64, scratch_operands = 0 : i64, tpu.core_type = #tpu.core_type<tc>, window_params = [{transform_indices = @transform_0, window_bounds = array<i64: 1, 16, 128>}, {pipeline_mode = #tpu.pipeline_mode<synchronous>, transform_indices = @transform_1, window_bounds = array<i64: 8, 16>}, {pipeline_mode = #tpu.pipeline_mode<synchronous>, transform_indices = @transform_2, window_bounds = array<i64: 8, 1>}, {transform_indices = @transform_3, window_bounds = array<i64: 1, 8, 128>}]} {
    %c0 = arith.constant 0 : index
    %c0_0 = arith.constant 0 : index
    %c0_1 = arith.constant 0 : index
    %0 = vector.load %arg2[%c0, %c0_0, %c0_1] : memref<1x16x128xbf16, #tpu.memory_space<vmem>>, vector<1x16x128xbf16>
    %1 = vector.shape_cast %0 : vector<1x16x128xbf16> to vector<16x128xbf16>
    %c0_2 = arith.constant 0 : index
    %c0_3 = arith.constant 0 : index
    %2 = vector.load %arg3[%c0_2, %c0_3] : memref<8x16xbf16, #tpu.memory_space<vmem>>, vector<8x16xbf16>
    %cst = arith.constant dense<0.000000e+00> : vector<8x128xf32>
    %3 = tpu.matmul %2, %1, %cst {dimension_numbers = #tpu.dot_dimension_numbers<[1], [0], [0], [1], [0, 0, 1, 1], [], []>} : vector<8x16xbf16>, vector<16x128xbf16>, vector<8x128xf32> -> vector<8x128xf32>
    %c0_4 = arith.constant 0 : index
    %c0_5 = arith.constant 0 : index
    %4 = vector.load %arg4[%c0_4, %c0_5] : memref<8x1xf32, #tpu.memory_space<vmem>>, vector<8x1xf32>
    %5 = vector.broadcast %4 : vector<8x1xf32> to vector<8x128xf32>
    %6 = arith.addf %3, %5 : vector<8x128xf32>
    %7 = vector.extract_strided_slice %1 {offsets = [4, 0], sizes = [8, 128], strides = [1, 1]} : vector<16x128xbf16> to vector<8x128xbf16>
    %8 = arith.extf %7 : vector<8x128xbf16> to vector<8x128xf32>
    %9 = arith.addf %6, %8 : vector<8x128xf32>
    %10 = math.tanh %9 : vector<8x128xf32>
    %c0_6 = arith.constant 0 : index
    %c0_7 = arith.constant 0 : index
    %c0_8 = arith.constant 0 : index
    %11 = vector.load %arg5[%c0_6, %c0_7, %c0_8] : memref<1x8x128xf32, #tpu.memory_space<vmem>>, vector<1x8x128xf32>
    %12 = vector.shape_cast %11 : vector<1x8x128xf32> to vector<8x128xf32>
    %13 = vector.shape_cast %10 : vector<8x128xf32> to vector<1x8x128xf32>
    tpu.vector_store %arg5[%c0_6, %c0_7, %c0_8], %13 {strides = array<i32>} : memref<1x8x128xf32, #tpu.memory_space<vmem>>, vector<1x8x128xf32>,
    return
  }
  func.func @transform_0(%arg0: i32, %arg1: i32) -> (i32, i32, i32) {
    %c0_i32 = arith.constant 0 : i32
    %c0_i32_0 = arith.constant 0 : i32
    return %arg0, %c0_i32, %arg1 : i32, i32, i32
  }
  func.func @transform_1(%arg0: i32, %arg1: i32) -> (i32, i32) {
    %c0_i32 = arith.constant 0 : i32
    %c0_i32_0 = arith.constant 0 : i32
    %c0_i32_1 = arith.constant 0 : i32
    return %c0_i32, %c0_i32_0 : i32, i32
  }
  func.func @transform_2(%arg0: i32, %arg1: i32) -> (i32, i32) {
    %c0_i32 = arith.constant 0 : i32
    %c0_i32_0 = arith.constant 0 : i32
    %c0_i32_1 = arith.constant 0 : i32
    return %c0_i32, %c0_i32_0 : i32, i32
  }
  func.func @transform_3(%arg0: i32, %arg1: i32) -> (i32, i32, i32) {
    %c0_i32 = arith.constant 0 : i32
    %c0_i32_0 = arith.constant 0 : i32
    return %arg0, %c0_i32, %arg1 : i32, i32, i32
  }
}

</mosaic_0001>

<bundles_post_ra>
// kernel: tpu_custom_call.1
= control target key start
LH: loop header
LB: loop body
LE: loop exit
PB: predicated region body
PF: predicated region fallthrough
CT: control target
= control target key end

     0   :  { %8 = vsyncpa [#allocation3], 0  ;;  %s795_s0 = inlined_call_operand.hbm [shape: bf16[2,16,128], index: 0, kind: input, shape index: {}]   ;;  %s796_s1 = inlined_call_operand.vmem [shape: bf16[8,16], index: 1, kind: input, shape index: {}]   ;;  %s797_s2 = inlined_call_operand.vmem [shape: f32[8,1], index: 2, kind: input, shape index: {}]   ;;  %s798_s3 = inlined_call_operand.hbm [shape: f32[2,8,128], index: 3, kind: output, shape index: {}]  }
   0x1   :  { %10 = vsyncpa [#allocation3 + $0x1], 0 }
   0x2   :  { %11 = vsyncpa [#allocation4], 0 }
   0x3   :  { %13 = vsyncpa [#allocation4 + $0x1], 0  ;;  %s612_s12 = smov 0   ;;  %s614_s13 = smov 0  }
   0x4   :  { %s616_s14 = smov 0   ;;  %s618_s15 = smov 0  }
   0x5   :  { %s620_s16 = smov 0   ;;  %s622_s17 = smov 0  }
   0x6 LB: > { %s374_s18 = sadd.s32 4294967295, %s583_s17   ;;  %s375_s19 = sadd.s32 4294967294, %s583_s17   ;;  %s583_s17 = sphi %s622_s17, %s19_s17   ;;  %s579_s16 = sphi %s620_s16, %s813_s16   ;;  %s575_s15 = sphi %s618_s15, %s812_s15   ;;  %s571_s14 = sphi %s616_s14, %s811_s14   ;;  %s567_s13 = sphi %s614_s13, %s810_s13   ;;  %s563_s12 = sphi %s612_s12, %s809_s12  }
   0x7   : > { %s31_s20 = sadd.s32 1, %s579_s16  ;;  %s40_s21 = sadd.s32 1, %s571_s14 }
   0x8   : > { %p33_p0 = scmp.ge.s32.totalorder %s31_s20, 2  ;;  %p47_p1 = scmp.ne.s32.totalorder %s571_s14, %s567_s13 }
   0x9   : > { %p48_p2 = scmp.eq.s32.totalorder %s583_s17, 0  ;;  %p53_p3 = scmp.ne.s32.totalorder %s567_s13, %s563_s12 }
   0xa   : > { %s815_s20 = smov (%p33_p0, %s31_s20), 0  ;;  %p54_p5 = scmp.eq.s32.totalorder %s374_s18, 0 }
   0xb   : > { %p653_p4 = por %p48_p2, %p47_p1  ;;  %s35_s23 = ssub.s32 %s579_s16, %s815_s20 }
   0xc   : > { %p121_p6 = scmp.eq.s32.totalorder %s374_s18, 1  ;;  %p38_p7 = scmp.eq.s32.totalorder %s35_s23, 0 }
   0xd   : > { %p659_p8 = por %p54_p5, %p53_p3  ;;  %p127_p10 = scmp.eq.s32.totalorder %s375_s19, 1 }
   0xe   : > { %p663_p9 = por %p121_p6, %p47_p1  ;;  %p411_p13 = scmp.lt.s32.totalorder %s583_s17, 2 }
   0xf   : > { %s668_s26 = scalar_select %p38_p7, %s571_s14, %s40_s21  }
  0x10   : > { %s802_s25 = scalar_select %p663_p9, 1, 0 }
  0x11   : > { %p670_p11 = por %p127_p10, %p53_p3  ;;  %s153_s28 = sand.u32 1, %s571_s14  }
  0x12   : > { %s378_s29 = sshll.u32 %s153_s28, 3  ;;  %s390_s30 = sshll.u32 %s579_s16, 7 }
  0x13   : > { %s803_s27 = scalar_select %p670_p11, 1, 0 }
  0x14   : > { %s681_s6 = scalar_lea.hbm %s795_s0, %s390_s30  ;;  %s157_s7 = scalar_lea.vmem [#allocation2], %s378_s29 }
  0x15   : > { %s165_s8 = sshll.u32 %s157_s7, 4  ;;  %p687_p0 = pnand %p411_p13, %p653_p4  ;;  %s683_s8 = int_to_ptr.vmem [resolvable:$true] %s165_s8 }
  0x16   : > { %s692_s10 = scalar_lea.sflag [#allocation3], %s153_s28  ;;  %s471_s11 = scalar_lea.hbm %s681_s6, 128 }
  0x17   : > { %p472_p2 = scmp.ne.s32.totalorder %s681_s6, %s471_s11  ;;  %p473_p3 = pneg %p687_p0 }
  0x18   : > { %s476_s21 = scalar_lea.hbm %s795_s0, 256  ;;  %p477_p4 = scmp.lt.u32.totalorder %s681_s6, %s795_s0 }
  0x19   : > { %p474_p5 = pnand %p473_p3, %p472_p2  ;;  %p478_p7 = scmp.lt.u32.totalorder %s476_s21, %s471_s11 }
  0x1a   : > { %p480_p13 = scmp.lt.u32.totalorder %s471_s11, %s681_s6 }
  0x1b   : > { %p475_p6 = pneg %p474_p5  ;;  %p479_p10 = por %p478_p7, %p477_p4 }
  0x1d   : > { %p481_p12 = por %p480_p13, %p479_p10 }
  0x1f   : > { %p482_p1 = pnand %p481_p12, %p475_p6 }
  0x21   : > { %485 = shalt.err (!%p482_p1)
}
  0x22   : > { %s486_s28 = scalar_lea.vmem %s683_s8, 128  ;;  %s585_s29 = smov [#allocation2]  }
  0x23   : > { %p487_p2 = scmp.ne.s32.totalorder %s683_s8, %s486_s28  ;;  %s491_s30 = sshll.u32 %s585_s29, 4  ;;  %s492_s30 = int_to_ptr.vmem [resolvable:$false] %s491_s30 }
  0x24   : > { %s493_s4 = scalar_lea.vmem %s492_s30, 256  ;;  %p494_p9 = scmp.lt.s32.totalorder %s683_s8, %s492_s30 }
  0x25   : > { %p489_p5 = pnand %p487_p2, %p473_p3  ;;  %p495_p4 = scmp.lt.s32.totalorder %s493_s4, %s486_s28 }
  0x27   : > { %p490_p11 = pneg %p489_p5  ;;  %p496_p7 = por %p495_p4, %p494_p9 }
  0x29   : > { %p497_p10 = pnand %p496_p7, %p490_p11 }
  0x2b   : > { %500 = shalt.err (!%p497_p10)
}
  0x2c   : > { %s586_s5 = smov 64   ;;  %s587_s7 = smov 4  }
  0x2d   : > { %406 = dma.hbm_to_vmem [thread:$0]  (!%p687_p0), %s681_s6, 128, %s683_s8, %s692_s10, %s586_s5, %s586_s5, %s587_s7  }
  0x2e   : > { %p173_p12 = scmp.lt.s32.totalorder %s583_s17, 3  ;;  %p805_p1 = scmp.ge.s32.totalorder %s583_s17, 1 }
  0x30   : > { %p174_p3 = pnand %p805_p1, %p173_p12 }
  0x31   : > { %s724_s11 = sand.u32 (!%p174_p3), 1, %s567_s13  }
  0x32   : > { %177 = sbr.rel (%p174_p3) target bundleno = 304 (0x130), region = 32  ;;  %s382_s18 = sshll.u32 (!%p174_p3), %s724_s11, 3 }
  0x33   : > { %s180_s19 = scalar_lea.sflag (!%p174_p3), [#allocation3], %s724_s11  ;;  %s183_s21 = scalar_lea.vmem (!%p174_p3), [#allocation2], %s382_s18 }
  0x39   : > { %554 = dma.done.wait (%p659_p8), %s180_s19, 128  }
  0x3a   : > { %556 = vsyncadd (%p659_p8), %s180_s19, 4294967168  ;;  %v588_v0 = vmov 0.0   ;;  %vm589_vm0 = vmmov 0   ;;  %v590_v1 = vmov 0   ;;  %v207_v2 = vld [vmem:[%s183_s21] sm:$0xff]   ;;  %vm222_vm1 = vcmask 130048  }
  0x3b   : > { %393 = vmatprep.subr.bf16.mxu0 %v588_v0  ;;  %395 = vmatprep.mubr.msk.bf16.mxu0 %vm589_vm0, %v588_v0  ;;  %v210_v3 = vld [vmem:[%s797_s2] sm:$0xff]  ;;  %v266_v5 = vunpack.c.l.bf16 %v207_v2  ;;  %v267_v6 = vunpack.c.h.bf16 %v207_v2  ;;  %vm270_vm2 = vcmask 1043456   ;;  %s387_s24 = sshll.u32 %s575_s15, 7  ;;  %s205_s22 = scalar_lea.vmem [#allocation5], %s382_s18 }
  0x3c   : > { %466 = vset.pattern.permute.xlu0 %v590_v1  ;;  %394 = vmatpush3.bf16.msra.mxu0 %v207_v2  ;;  %v209_v4 = vld [vmem:[%s796_s1] sm:$0xf]  ;;  %s293_s23 = sshll.u32 %s205_s22, 4  ;;  %s746_s30 = scalar_lea.hbm %s798_s3, %s387_s24  ;;  %s748_s23 = int_to_ptr.vmem [resolvable:$true] %s293_s23 }
  0x3d   : > { %213 = vperm.xlu0 %466, %v210_v3   ;;  %v271_v7 = vrot.slane %v266_v5, 4  ;;  %v272_v8 = vrot.slane %v267_v6, 4  ;;  %s279_s4 = scalar_lea.sflag [#allocation4], %s724_s11  ;;  %s501_s5 = scalar_lea.vmem %s748_s23, 128 }
  0x3e   : > { %p502_p8 = scmp.ne.s32.totalorder %s748_s23, %s501_s5  ;;  %p806_p9 = scmp.ne.s32.totalorder %s802_s25, 0 }
  0x3f   : > { %396 = vmatmul.mubr.msk.bf16.vlgmr.msra.gmra.mrb[0].mxu0 %vm222_vm1, %v209_v4  ;;  %v273_v11 = vsel %vm270_vm2, %v271_v7, %v272_v8  ;;  %s591_s15 = smov [#allocation5]  }
  0x40   : > { %p503_p11 = pnand %p502_p8, %p806_p9  ;;  %s505_s7 = sshll.u32 %s591_s15, 4  ;;  %s506_s7 = int_to_ptr.vmem [resolvable:$false] %s505_s7 }
  0x41   : > { %s507_s18 = scalar_lea.vmem %s506_s7, 256  ;;  %p508_p6 = scmp.lt.s32.totalorder %s748_s23, %s506_s7 }
  0x42   : > { %p504_p0 = pneg %p503_p11  ;;  %p509_p13 = scmp.lt.s32.totalorder %s507_s18, %s501_s5 }
  0x44   : > { %p510_p2 = por %p509_p13, %p508_p6 }
  0x46   : > { %p511_p5 = pnand %p510_p2, %p504_p0 }
  0xbc   : > { %v214_v9 = vpop.permute.xlu0 %213 }
 0x112   : > { %v260_v10 = vpop.f32.mrb[0].mxu0 }
 0x113   : > { %v261_v12 = vadd.f32 %v260_v10, %v214_v9  ;;  %v397_v13 = vpop.f32.mrb[1].mxu0 }
 0x114   : > { %v263_v14 = vpop.f32.mrb[2].mxu0 }
 0x115   : > { %v275_v15 = vadd.f32 %v273_v11, %v261_v12  ;;  %v398_v16 = vpop.f32.mrb[3].mxu0 }
 0x117   : > { %469 = vtanh.f32 %v275_v15 }
 0x121   : > { %v470_v17 = vpop.eup %469 }
 0x122   : > { %277 = vst [vmem:[%s205_s22] sm:$0xff] %v470_v17 }
 0x123   : > { %514 = shalt.err (!%p511_p5)
}
 0x124   : > { %s515_s11 = scalar_lea.hbm %s746_s30, 128  ;;  %s519_s6 = scalar_lea.hbm %s798_s3, 256 }
 0x125   : > { %p516_p4 = scmp.ne.s32.totalorder %s746_s30, %s515_s11  ;;  %p520_p12 = scmp.lt.u32.totalorder %s746_s30, %s798_s3 }
 0x126   : > { %p521_p1 = scmp.lt.u32.totalorder %s519_s6, %s515_s11  ;;  %p523_p8 = scmp.lt.u32.totalorder %s515_s11, %s746_s30 }
 0x127   : > { %p517_p7 = pnand %p516_p4, %p806_p9 }
 0x128   : > { %p522_p3 = por %p521_p1, %p520_p12 }
 0x129   : > { %p518_p10 = pneg %p517_p7 }
 0x12a   : > { %p524_p11 = por %p523_p8, %p522_p3 }
 0x12c   : > { %p525_p0 = pnand %p524_p11, %p518_p10 }
 0x12e   : > { %528 = shalt.err (!%p525_p0)
}
 0x12f   : > { %401 = dma.vmem_to_hbm [thread:$0]  (%p806_p9), %s748_s23, 128, %s746_s30, %s279_s4  }
 0x130 PF: > { %s305_s10 = sand.u32 1, %s563_s12   ;;  %p807_p6 = scmp.ne.s32.totalorder %s803_s27, 0 }
 0x131   : > { %p808_p13 = scmp.ge.s32.totalorder %s583_s17, 2  ;;  %s306_s24 = scalar_lea.sflag [#allocation4], %s305_s10 }
 0x133   : > { %p408_p2 = pnand %p808_p13, %p807_p6 }
 0x135   : > { %558 = dma.done.wait (!%p408_p2), %s306_s24, 128  }
 0x136   : > { %560 = vsyncadd (!%p408_p2), %s306_s24, 4294967168  ;;  %s19_s17 = sadd.s32 1, %s583_s17   ;;  %s809_s12 = smov %s567_s13 }
 0x137   : > { %p16_p5 = scmp.ge.s32.totalorder %s19_s17, 4   ;;  %s810_s13 = smov %s571_s14 }
 0x138   : > { %s811_s14 = smov %s668_s26  ;;  %s812_s15 = smov %s579_s16 }
 0x139   : > { %s813_s16 = smov %s815_s20  ;;  %18 = sbr.rel (!%p16_p5) target bundleno = 6 (0x6), region = 77 }
 0x140   :  { %311 = vsyncpa [#allocation3], 1 }
 0x141   :  { %313 = vsyncpa [#allocation3 + $0x1], 1 }
 0x142   :  { %314 = vsyncpa [#allocation4], 1 }
 0x143   :  { %316 = vsyncpa [#allocation4 + $0x1], 1 }

</bundles_post_ra>
